<compile_context>
chip_gen: v7x
topology: tpu7x:2x2x1
jax: 0.10.0
libtpu: 0.0.40
codegen_flags: <defaults>
</compile_context>

<pallas_src>
import functools

import jax
import jax.numpy as jnp
import numpy as np
from jax import lax
from jax.experimental import pallas as pl
from jax.experimental.pallas import tpu as pltpu


def _cbam_kernel(x_ref, w1t_ref, w2t_ref, wm_ref, wa_ref, bsa_ref, out_ref,
                 *, inv_hw, inv_c):
    # x_ref/out_ref: (Bt, C, H*W)  lane-dense per-step slab
    # w1t_ref: (C, Cr), w2t_ref: (Cr, C)   -- transposed channel-attention 1x1 convs
    # wm_ref/wa_ref: (H*W, H*W)            -- KxK conv (max / avg channel) as matmuls
    # bsa_ref: SMEM (1,) spatial-conv bias
    xb = x_ref[...].astype(jnp.float32)                       # (Bt, C, HW)
    bt = xb.shape[0]

    # ---------------- Channel attention ----------------
    # AdaptiveMaxPool2d(1) / AdaptiveAvgPool2d(1): one lane-axis reduction each.
    maxp = jnp.max(xb, axis=-1)                               # (Bt, C)
    avgp = jnp.sum(xb, axis=-1) * inv_hw                      # (Bt, C)

    # Shared SE MLP applied to both pooled vectors with one pair of matmuls.
    m = jnp.concatenate([maxp, avgp], axis=0)                 # (2*Bt, C)
    h = jnp.maximum(
        jnp.dot(m, w1t_ref[...], preferred_element_type=jnp.float32), 0.0)
    y = jnp.dot(h, w2t_ref[...], preferred_element_type=jnp.float32)  # (2*Bt, C)
    ca3 = jax.nn.sigmoid(y[:bt] + y[bt:])[:, :, None]         # (Bt, C, 1)

    out1 = xb * ca3                                           # (Bt, C, HW) = x * ca

    # ---------------- Spatial attention ----------------
    max_c = jnp.max(out1, axis=1)                             # (Bt, HW)
    avg_c = jnp.sum(out1, axis=1) * inv_c                     # (Bt, HW)

    # 2-channel KxK conv + bias as two dense matmuls on the MXU (no lane concat).
    conv = (jnp.dot(max_c, wm_ref[...], preferred_element_type=jnp.float32)
            + jnp.dot(avg_c, wa_ref[...], preferred_element_type=jnp.float32)
            + bsa_ref[0])
    sa = jax.nn.sigmoid(conv)                                 # (Bt, HW)

    # out = out1 * sa + x   (out1 already live -> only 2 full-slab VPU passes)
    out_ref[...] = (out1 * sa[:, None, :] + xb).astype(out_ref.dtype)


def _spatial_conv_halves(w_sa, H, W, K):
    """Build Wm, Wa (each (H*W, H*W), numpy f32) s.t.
       conv2d(cat[max, avg]) flattened == max_flat @ Wm + avg_flat @ Wa.
    Wc[i*W+j, y*W+x] = w_sa[0, c, i-y+P, j-x+P] if the tap is in range, else 0
    (implements zero padding P = K//2)."""
    w = np.asarray(w_sa, np.float32)                          # (1, 2, K, K)
    P = K // 2
    sp = np.arange(H * W)
    ii, jj = np.divmod(sp, W)                                 # input position (rows)
    oy, ox = np.divmod(sp, W)                                 # output position (cols)
    kh = ii[:, None] - oy[None, :] + P                        # (HW, HW)
    kw = jj[:, None] - ox[None, :] + P
    valid = (kh >= 0) & (kh < K) & (kw >= 0) & (kw < K)
    kh_c = np.clip(kh, 0, K - 1)
    kw_c = np.clip(kw, 0, K - 1)
    wm = np.where(valid, w[0, 0, kh_c, kw_c], 0.0).astype(np.float32)
    wa = np.where(valid, w[0, 1, kh_c, kw_c], 0.0).astype(np.float32)
    return wm, wa


def make_cbam_params(w1, w2, w_sa, b_sa, kernel_size, H, W):
    """Precompute (once, in numpy) all derived weight tensors the kernel needs."""
    wm, wa = _spatial_conv_halves(w_sa, H, W, kernel_size)
    return {
        "w1t": jnp.asarray(np.asarray(w1, np.float32).T),     # (C, Cr)
        "w2t": jnp.asarray(np.asarray(w2, np.float32).T),     # (Cr, C)
        "wm": jnp.asarray(wm),                                # (HW, HW)
        "wa": jnp.asarray(wa),                                # (HW, HW)
        "bsa": jnp.asarray(np.asarray(b_sa, np.float32).reshape(1)),
    }


def _pick_batch_tile(B, C, HW, x_itemsize, requested=None):
    """Largest divisor of B within a VMEM budget; keep >=2 grid steps if possible."""
    # Per-image VMEM bytes: double-buffered in + out blocks plus the two f32
    # full-slab temporaries (xb, out1) live inside the kernel.
    per_item = 4 * C * HW * x_itemsize + 2 * C * HW * 4
    budget = 12 * 1024 * 1024          # stays inside v5e's 16 MiB default scoped VMEM
    cap = max(1, budget // per_item)
    target = int(min(B, cap, requested if requested is not None else 128))
    bt = max(d for d in range(1, max(target, 1) + 1) if B % d == 0)
    # Keep at least 2 grid steps when possible so the "parallel" batch axis can
    # be sharded across v7x's two TensorCores (negligible cost on v5e/v6e).
    if bt == B and B > 1:
        bt = max(d for d in range(1, B) if B % d == 0)
    return bt


def cbam_forward(x, params, batch_tile=None):
    B, C, H, W = x.shape
    HW = H * W
    Bt = _pick_batch_tile(B, C, HW, x.dtype.itemsize, batch_tile)

    # Lane-dense view: last dim H*W (256 lanes fully packed for H=W=16).
    x2 = x.reshape(B, C, HW)
    w1t, w2t, wm, wa, bsa = (params["w1t"], params["w2t"], params["wm"],
                             params["wa"], params["bsa"])

    kernel = functools.partial(_cbam_kernel, inv_hw=1.0 / HW, inv_c=1.0 / C)
    out2 = pl.pallas_call(
        kernel,
        out_shape=jax.ShapeDtypeStruct((B, C, HW), x.dtype),
        grid=(B // Bt,),
        in_specs=[
            pl.BlockSpec((Bt, C, HW), lambda b: (b, 0, 0)),              # x slab
            pl.BlockSpec(w1t.shape, lambda b: (0, 0)),                   # W1^T
            pl.BlockSpec(w2t.shape, lambda b: (0, 0)),                   # W2^T
            pl.BlockSpec(wm.shape, lambda b: (0, 0)),                    # conv (max half)
            pl.BlockSpec(wa.shape, lambda b: (0, 0)),                    # conv (avg half)
            pl.BlockSpec(memory_space=pltpu.MemorySpace.SMEM),           # conv bias
        ],
        out_specs=pl.BlockSpec((Bt, C, HW), lambda b: (b, 0, 0)),
        # Batches are independent -> parallel (megacore sharding on v7x).
        compiler_params=pltpu.CompilerParams(dimension_semantics=("parallel",)),
    )(x2, w1t, w2t, wm, wa, bsa)
    return out2.reshape(B, C, H, W)


def cbam_reference(x, w1, w2, w_sa, b_sa, kernel_size):
    """Pure-JAX reference matching the PyTorch forward (f32-exact precision)."""
    hp = lax.Precision.HIGHEST
    maxp = jnp.max(x, axis=(2, 3), keepdims=True)
    avgp = jnp.mean(x, axis=(2, 3), keepdims=True)

    def se(v):
        v2 = v[:, :, 0, 0]                                    # (B, C)
        h = jnp.maximum(jnp.dot(v2, w1.T, precision=hp), 0.0)
        return jnp.dot(h, w2.T, precision=hp)[:, :, None, None]

    ca = jax.nn.sigmoid(se(maxp) + se(avgp))
    out = x * ca
    maxc = jnp.max(out, axis=1, keepdims=True)
    avgc = jnp.mean(out, axis=1, keepdims=True)
    cat = jnp.concatenate([maxc, avgc], axis=1)               # (B, 2, H, W)
    conv = lax.conv_general_dilated(
        cat, w_sa, window_strides=(1, 1),
        padding=[(kernel_size // 2, kernel_size // 2)] * 2,
        dimension_numbers=("NCHW", "OIHW", "NCHW"), precision=hp)
    sa = jax.nn.sigmoid(conv + b_sa[None, :, None, None])
    return out * sa + x


if __name__ == "__main__":
    # Small CBAM config: channel=16, reduction=4, spatial 16x16, kernel_size=7.
    B, C, H, W = 2, 16, 16, 16
    reduction = 4
    Cr = C // reduction
    K = 7

    key = jax.random.PRNGKey(0)
    k1, k2, k3, k4, k5 = jax.random.split(key, 5)
    x = jax.random.normal(k1, (B, C, H, W), jnp.float32)
    # Deterministic kaiming-ish init (fan_out) for the conv weights.
    w1 = jax.random.normal(k2, (Cr, C), jnp.float32) * (2.0 / Cr) ** 0.5
    w2 = jax.random.normal(k3, (C, Cr), jnp.float32) * (2.0 / C) ** 0.5
    w_sa = jax.random.normal(k4, (1, 2, K, K), jnp.float32) * (2.0 / (K * K)) ** 0.5
    b_sa = jax.random.normal(k5, (1,), jnp.float32) * 0.01

    params = make_cbam_params(w1, w2, w_sa, b_sa, K, H, W)    # once, off the hot path
    out = jax.block_until_ready(cbam_forward(x, params))
    ref = cbam_reference(x, w1, w2, w_sa, b_sa, K)

    assert out.shape == (B, C, H, W)
    np.testing.assert_allclose(np.asarray(out), np.asarray(ref), rtol=2e-4, atol=1e-4)
    print("KERNEL_OK")
</pallas_src>

<mosaic_0001>
module attributes {stable_mosaic.version = 11 : i64} {
  func.func @_cbam_kernel(%arg0: i32, %arg1: memref<1x16x256xf32, #tpu.memory_space<vmem>>, %arg2: memref<16x4xf32, #tpu.memory_space<vmem>>, %arg3: memref<4x16xf32, #tpu.memory_space<vmem>>, %arg4: memref<256x256xf32, #tpu.memory_space<vmem>>, %arg5: memref<256x256xf32, #tpu.memory_space<vmem>>, %arg6: memref<1xf32, #tpu.memory_space<smem>>, %arg7: memref<1x16x256xf32, #tpu.memory_space<vmem>>) attributes {dimension_semantics = [#tpu.dimension_semantics<parallel>], iteration_bounds = array<i64: 2>, scalar_prefetch = 0 : i64, scratch_operands = 0 : i64, tpu.core_type = #tpu.core_type<tc>, window_params = [{transform_indices = @transform_0, window_bounds = array<i64: 1, 16, 256>}, {pipeline_mode = #tpu.pipeline_mode<synchronous>, transform_indices = @transform_1, window_bounds = array<i64: 16, 4>}, {pipeline_mode = #tpu.pipeline_mode<synchronous>, transform_indices = @transform_2, window_bounds = array<i64: 4, 16>}, {pipeline_mode = #tpu.pipeline_mode<synchronous>, transform_indices = @transform_3, window_bounds = array<i64: 256, 256>}, {pipeline_mode = #tpu.pipeline_mode<synchronous>, transform_indices = @transform_4, window_bounds = array<i64: 256, 256>}, {transform_indices = @transform_5, window_bounds = array<i64: 1>}, {transform_indices = @transform_6, window_bounds = array<i64: 1, 16, 256>}]} {
    %c0 = arith.constant 0 : index
    %c0_0 = arith.constant 0 : index
    %c0_1 = arith.constant 0 : index
    %0 = vector.load %arg1[%c0, %c0_0, %c0_1] : memref<1x16x256xf32, #tpu.memory_space<vmem>>, vector<1x16x256xf32>
    %cst = arith.constant dense<0xFF800000> : vector<1x16xf32>
    %1 = vector.multi_reduction <maximumf>, %0, %cst [2] : vector<1x16x256xf32> to vector<1x16xf32>
    %cst_2 = arith.constant dense<0.000000e+00> : vector<1x16xf32>
    %2 = vector.multi_reduction <add>, %0, %cst_2 [2] : vector<1x16x256xf32> to vector<1x16xf32>
    %cst_3 = arith.constant 3.906250e-03 : f32
    %3 = vector.broadcast %cst_3 : f32 to vector<1x16xf32>
    %4 = arith.mulf %2, %3 : vector<1x16xf32>
    %5 = tpu.concatenate %1, %4 in 0 : vector<1x16xf32>, vector<1x16xf32> -> vector<2x16xf32>
    %c0_4 = arith.constant 0 : index
    %c0_5 = arith.constant 0 : index
    %6 = vector.load %arg2[%c0_4, %c0_5] : memref<16x4xf32, #tpu.memory_space<vmem>>, vector<16x4xf32>
    %cst_6 = arith.constant dense<0.000000e+00> : vector<2x4xf32>
    %7 = tpu.matmul %5, %6, %cst_6 {dimension_numbers = #tpu.dot_dimension_numbers<[1], [0], [0], [1], [0, 0, 1, 1], [], []>} : vector<2x16xf32>, vector<16x4xf32>, vector<2x4xf32> -> vector<2x4xf32>
    %cst_7 = arith.constant 0.000000e+00 : f32
    %8 = vector.broadcast %cst_7 : f32 to vector<2x4xf32>
    %9 = arith.maximumf %7, %8 : vector<2x4xf32>
    %c0_8 = arith.constant 0 : index
    %c0_9 = arith.constant 0 : index
    %10 = vector.load %arg3[%c0_8, %c0_9] : memref<4x16xf32, #tpu.memory_space<vmem>>, vector<4x16xf32>
    %cst_10 = arith.constant dense<0.000000e+00> : vector<2x16xf32>
    %11 = tpu.matmul %9, %10, %cst_10 {dimension_numbers = #tpu.dot_dimension_numbers<[1], [0], [0], [1], [0, 0, 1, 1], [], []>} : vector<2x4xf32>, vector<4x16xf32>, vector<2x16xf32> -> vector<2x16xf32>
    %12 = vector.extract_strided_slice %11 {offsets = [0, 0], sizes = [1, 16], strides = [1, 1]} : vector<2x16xf32> to vector<1x16xf32>
    %13 = vector.extract_strided_slice %11 {offsets = [1, 0], sizes = [1, 16], strides = [1, 1]} : vector<2x16xf32> to vector<1x16xf32>
    %14 = arith.addf %12, %13 : vector<1x16xf32>
    %15 = arith.negf %14 : vector<1x16xf32>
    %16 = math.exp %15 : vector<1x16xf32>
    %cst_11 = arith.constant 1.000000e+00 : f32
    %17 = vector.broadcast %cst_11 : f32 to vector<1x16xf32>
    %18 = arith.addf %17, %16 : vector<1x16xf32>
    %19 = arith.divf %17, %18 : vector<1x16xf32>
    %20 = vector.shape_cast %19 : vector<1x16xf32> to vector<1x16x1xf32>
    %21 = vector.broadcast %20 : vector<1x16x1xf32> to vector<1x16x256xf32>
    %22 = arith.mulf %0, %21 : vector<1x16x256xf32>
    %cst_12 = arith.constant dense<0xFF800000> : vector<1x256xf32>
    %23 = vector.multi_reduction <maximumf>, %22, %cst_12 [1] : vector<1x16x256xf32> to vector<1x256xf32>
    %cst_13 = arith.constant dense<0.000000e+00> : vector<1x256xf32>
    %24 = vector.multi_reduction <add>, %22, %cst_13 [1] : vector<1x16x256xf32> to vector<1x256xf32>
    %cst_14 = arith.constant 6.250000e-02 : f32
    %25 = vector.broadcast %cst_14 : f32 to vector<1x256xf32>
    %26 = arith.mulf %24, %25 : vector<1x256xf32>
    %c0_15 = arith.constant 0 : index
    %c0_16 = arith.constant 0 : index
    %27 = vector.load %arg4[%c0_15, %c0_16] : memref<256x256xf32, #tpu.memory_space<vmem>>, vector<256x256xf32>
    %cst_17 = arith.constant dense<0.000000e+00> : vector<1x256xf32>
    %28 = tpu.matmul %23, %27, %cst_17 {dimension_numbers = #tpu.dot_dimension_numbers<[1], [0], [0], [1], [0, 0, 1, 1], [], []>} : vector<1x256xf32>, vector<256x256xf32>, vector<1x256xf32> -> vector<1x256xf32>
    %c0_18 = arith.constant 0 : index
    %c0_19 = arith.constant 0 : index
    %29 = vector.load %arg5[%c0_18, %c0_19] : memref<256x256xf32, #tpu.memory_space<vmem>>, vector<256x256xf32>
    %cst_20 = arith.constant dense<0.000000e+00> : vector<1x256xf32>
    %30 = tpu.matmul %26, %29, %cst_20 {dimension_numbers = #tpu.dot_dimension_numbers<[1], [0], [0], [1], [0, 0, 1, 1], [], []>} : vector<1x256xf32>, vector<256x256xf32>, vector<1x256xf32> -> vector<1x256xf32>
    %31 = arith.addf %28, %30 : vector<1x256xf32>
    %c0_21 = arith.constant 0 : index
    %32 = memref.load %arg6[%c0_21] : memref<1xf32, #tpu.memory_space<smem>>
    %33 = vector.broadcast %32 : f32 to vector<1x256xf32>
    %34 = arith.addf %31, %33 : vector<1x256xf32>
    %35 = arith.negf %34 : vector<1x256xf32>
    %36 = math.exp %35 : vector<1x256xf32>
    %cst_22 = arith.constant 1.000000e+00 : f32
    %37 = vector.broadcast %cst_22 : f32 to vector<1x256xf32>
    %38 = arith.addf %37, %36 : vector<1x256xf32>
    %39 = arith.divf %37, %38 : vector<1x256xf32>
    %40 = vector.shape_cast %39 : vector<1x256xf32> to vector<1x1x256xf32>
    %41 = vector.broadcast %40 : vector<1x1x256xf32> to vector<1x16x256xf32>
    %42 = arith.mulf %22, %41 : vector<1x16x256xf32>
    %43 = arith.addf %42, %0 : vector<1x16x256xf32>
    %c0_23 = arith.constant 0 : index
    %c0_24 = arith.constant 0 : index
    %c0_25 = arith.constant 0 : index
    %44 = vector.load %arg7[%c0_23, %c0_24, %c0_25] : memref<1x16x256xf32, #tpu.memory_space<vmem>>, vector<1x16x256xf32>
    tpu.vector_store %arg7[%c0_23, %c0_24, %c0_25], %43 {strides = array<i32>} : memref<1x16x256xf32, #tpu.memory_space<vmem>>, vector<1x16x256xf32>,
    return
  }
  func.func @transform_0(%arg0: i32) -> (i32, i32, i32) {
    %c0_i32 = arith.constant 0 : i32
    %c0_i32_0 = arith.constant 0 : i32
    %c0_i32_1 = arith.constant 0 : i32
    return %arg0, %c0_i32, %c0_i32_0 : i32, i32, i32
  }
  func.func @transform_1(%arg0: i32) -> (i32, i32) {
    %c0_i32 = arith.constant 0 : i32
    %c0_i32_0 = arith.constant 0 : i32
    %c0_i32_1 = arith.constant 0 : i32
    return %c0_i32, %c0_i32_0 : i32, i32
  }
  func.func @transform_2(%arg0: i32) -> (i32, i32) {
    %c0_i32 = arith.constant 0 : i32
    %c0_i32_0 = arith.constant 0 : i32
    %c0_i32_1 = arith.constant 0 : i32
    return %c0_i32, %c0_i32_0 : i32, i32
  }
  func.func @transform_3(%arg0: i32) -> (i32, i32) {
    %c0_i32 = arith.constant 0 : i32
    %c0_i32_0 = arith.constant 0 : i32
    %c0_i32_1 = arith.constant 0 : i32
    return %c0_i32, %c0_i32_0 : i32, i32
  }
  func.func @transform_4(%arg0: i32) -> (i32, i32) {
    %c0_i32 = arith.constant 0 : i32
    %c0_i32_0 = arith.constant 0 : i32
    %c0_i32_1 = arith.constant 0 : i32
    return %c0_i32, %c0_i32_0 : i32, i32
  }
  func.func @transform_5(%arg0: i32) -> i32 {
    %c0_i32 = arith.constant 0 : i32
    %c0_i32_0 = arith.constant 0 : i32
    return %c0_i32 : i32
  }
  func.func @transform_6(%arg0: i32) -> (i32, i32, i32) {
    %c0_i32 = arith.constant 0 : i32
    %c0_i32_0 = arith.constant 0 : i32
    %c0_i32_1 = arith.constant 0 : i32
    return %arg0, %c0_i32, %c0_i32_0 : i32, i32, i32
  }
}

</mosaic_0001>

<bundles_post_ra>
// kernel: tpu_custom_call.1
= control target key start
LH: loop header
LB: loop body
LE: loop exit
PB: predicated region body
PF: predicated region fallthrough
CT: control target
= control target key end

     0   :  { %s1750_s0 = inlined_call_operand.hbm [shape: f32[2,16,256], index: 0, kind: input, shape index: {}]   ;;  %s1751_s1 = inlined_call_operand.vmem [shape: f32[16,4], index: 1, kind: input, shape index: {}]   ;;  %s1752_s2 = inlined_call_operand.vmem [shape: f32[4,16], index: 2, kind: input, shape index: {}]   ;;  %s1753_s3 = inlined_call_operand.hbm [shape: f32[256,256], index: 3, kind: input, shape index: {}]   ;;  %s1754_s4 = inlined_call_operand.hbm [shape: f32[256,256], index: 4, kind: input, shape index: {}]   ;;  %s1755_s5 = inlined_call_operand.<no memory space> [shape: f32[1], index: 5, kind: input, shape index: {}]   ;;  %s1756_s6 = inlined_call_operand.hbm [shape: f32[2,16,256], index: 6, kind: output, shape index: {}]  }
   0x1   :  { %11 = sst [smem:[#allocation2]] %s1755_s5 }
   0x2   :  { %12 = vsyncpa [#allocation4], 0 }
   0x3   :  { %14 = vsyncpa [#allocation4 + $0x1], 0 }
   0x4   :  { %15 = vsyncpa [#allocation7], 0 }
   0x5   :  { %16 = vsyncpa [#allocation5], 0 }
   0x6   :  { %18 = vsyncpa [#allocation5 + $0x1], 0  ;;  %s1440_s23 = smov 0   ;;  %s1442_s24 = smov 0  }
   0x7   :  { %s1444_s25 = smov 0   ;;  %s1446_s26 = smov 0  }
   0x8 LB: > { %s1461_s5 = sadd.s32 4294967295, %s1389_s26   ;;  %s971_s27 = sadd.s32 4294967294, %s1389_s26   ;;  %s1389_s26 = sphi %s1446_s26, %s1776_s26   ;;  %s1385_s25 = sphi %s1444_s25, %s1775_s25   ;;  %s1381_s24 = sphi %s1442_s24, %s1774_s24   ;;  %s1377_s23 = sphi %s1440_s23, %s1773_s23  }
   0x9   : > { %p44_p0 = scmp.ne.s32.totalorder %s1381_s24, %s1377_s23  ;;  %p1757_p1 = scmp.eq.s32.totalorder %s1461_s5, 0 }
   0xa   : > { %p179_p3 = scmp.eq.s32.totalorder %s971_s27, 1  ;;  %p972_p5 = scmp.ge.s32.totalorder %s1389_s26, 1 }
   0xb   : > { %p1470_p4 = por %p1757_p1, %p44_p0  ;;  %p186_p7 = scmp.lt.s32.totalorder %s1389_s26, 3 }
   0xc   : > { %p1475_p6 = por %p179_p3, %p44_p0  ;;  %s1391_s7 = smov [#allocation6]  }
   0xd   : > { %s1760_s28 = scalar_select %p1470_p4, 1, 0 }
   0xe   : > { %s1761_s29 = scalar_select %p1475_p6, 1, 0 }
   0xf   : > { %p1480_p8 = pnand %p972_p5, %p186_p7  ;;  %s204_s8 = sshll.u32 %s1391_s7, 4  ;;  %s1484_s8 = int_to_ptr.vmem [resolvable:$true] %s204_s8 }
  0x10   : > { %s1392_s10 = smov [#allocation8]   ;;  %s1233_s14 = scalar_lea.hbm %s1753_s3, 8192 }
  0x11   : > { %p1159_p9 = pneg %p1480_p8  ;;  %s217_s11 = sshll.u32 %s1392_s10, 4  ;;  %s1495_s11 = int_to_ptr.vmem [resolvable:$true] %s217_s11 }
  0x12   : > { %p1234_p12 = scmp.ne.s32.totalorder %s1753_s3, %s1233_s14  ;;  %p1240_p5 = scmp.lt.u32.totalorder %s1233_s14, %s1753_s3 }
  0x13   : > { %p1491_p11 = pnand %p1159_p9, %p1757_p1 }
  0x15   : > { %p1235_p13 = pneg %p1491_p11 }
  0x17   : > { %p1236_p0 = pnand %p1235_p13, %p1234_p12 }
  0x19   : > { %p1237_p3 = pneg %p1236_p0 }
  0x1b   : > { %p1242_p7 = pnand %p1240_p5, %p1237_p3 }
  0x1d   : > { %1245 = shalt.err (!%p1242_p7)
}
  0x1e   : > { %s1246_s19 = scalar_lea.vmem %s1484_s8, 8192  ;;  %p1254_p2 = scmp.lt.s32.totalorder %s1484_s8, %s1484_s8 }
  0x1f   : > { %p1247_p9 = scmp.ne.s32.totalorder %s1484_s8, %s1246_s19  ;;  %p1255_p12 = scmp.lt.s32.totalorder %s1246_s19, %s1246_s19 }
  0x21   : > { %p1249_p10 = pnand %p1247_p9, %p1235_p13  ;;  %p1256_p0 = por %p1255_p12, %p1254_p2 }
  0x23   : > { %p1250_p1 = pneg %p1249_p10 }
  0x25   : > { %p1257_p6 = pnand %p1256_p0, %p1250_p1 }
  0x27   : > { %1260 = shalt.err (!%p1257_p6)
}
  0x28   : > { %s1393_s20 = smov 256   ;;  %s1394_s21 = smov 16  }
  0x29   : > { %1162 = dma.hbm_to_vmem [thread:$0]  (!%p1491_p11), %s1753_s3, 8192, %s1484_s8, [#allocation7], %s1393_s20, %s1393_s20, %s1394_s21  }
  0x2a   : > { %s1261_s12 = scalar_lea.hbm %s1754_s4, 8192 }
  0x2b   : > { %p1262_p1 = scmp.ne.s32.totalorder %s1754_s4, %s1261_s12  ;;  %p1268_p10 = scmp.lt.u32.totalorder %s1261_s12, %s1754_s4 }
  0x2d   : > { %p1264_p2 = pnand %p1262_p1, %p1235_p13 }
  0x2f   : > { %p1265_p6 = pneg %p1264_p2 }
  0x31   : > { %p1270_p3 = pnand %p1268_p10, %p1265_p6 }
  0x33   : > { %1273 = shalt.err (!%p1270_p3)
}
  0x34   : > { %s1274_s8 = scalar_lea.vmem %s1495_s11, 8192  ;;  %p1282_p12 = scmp.lt.s32.totalorder %s1495_s11, %s1495_s11 }
  0x35   : > { %p1275_p5 = scmp.ne.s32.totalorder %s1495_s11, %s1274_s8  ;;  %p1283_p0 = scmp.lt.s32.totalorder %s1274_s8, %s1274_s8 }
  0x37   : > { %p1277_p7 = pnand %p1275_p5, %p1235_p13  ;;  %p1284_p1 = por %p1283_p0, %p1282_p12 }
  0x39   : > { %p1278_p9 = pneg %p1277_p7 }
  0x3b   : > { %p1285_p2 = pnand %p1284_p1, %p1278_p9 }
  0x3d   : > { %1288 = shalt.err (!%p1285_p2)
}
  0x3e   : > { %1165 = dma.hbm_to_vmem [thread:$0]  (!%p1491_p11), %s1754_s4, 8192, %s1495_s11, [#allocation7], %s1393_s20, %s1393_s20, %s1394_s21  }
  0x3f   : > { %s1556_s9 = sadd.s32 1, %s1389_s26   ;;  %s31_s19 = sadd.s32 1, %s1385_s25 }
  0x40   : > { %s28_s22 = ssub.s32 %s1389_s26, %s1556_s9  ;;  %p38_p13 = scmp.ne.s32.totalorder %s1385_s25, %s1381_s24 }
  0x41   : > { %p29_p6 = scmp.eq.s32.totalorder %s28_s22, 0  ;;  %p39_p10 = scmp.eq.s32.totalorder %s1389_s26, 0 }
  0x42   : > { %p1764_p3 = scmp.eq.s32.totalorder %s1461_s5, 1  ;;  %p1176_p7 = scmp.lt.s32.totalorder %s1389_s26, 2 }
  0x43   : > { %s1572_s7 = scalar_select %p29_p6, %s1385_s25, %s31_s19  }
  0x44   : > { %p1566_p5 = por %p1764_p3, %p38_p13  ;;  %p40_p9 = por %p39_p10, %p38_p13 }
  0x45   : > { %s234_s10 = sand.u32 1, %s1385_s25   ;;  %s995_s11 = sshll.u32 %s1389_s26, 9 }
  0x46   : > { %s1765_s27 = scalar_select %p1566_p5, 1, 0 }
  0x47   : > { %s976_s12 = sshll.u32 %s234_s10, 5  ;;  %s1579_s15 = scalar_lea.hbm %s1750_s0, %s995_s11 }
  0x48   : > { %s238_s16 = scalar_lea.vmem [#allocation3], %s976_s12  ;;  %p1583_p11 = pnand %p1176_p7, %p40_p9 }
  0x49   : > { %s245_s8 = sshll.u32 %s238_s16, 4  ;;  %s1587_s18 = scalar_lea.sflag [#allocation4], %s234_s10  ;;  %s1581_s8 = int_to_ptr.vmem [resolvable:$true] %s245_s8 }
  0x4a   : > { %s1289_s19 = scalar_lea.hbm %s1579_s15, 512  ;;  %p1291_p0 = pneg %p1583_p11 }
  0x4b   : > { %p1290_p12 = scmp.ne.s32.totalorder %s1579_s15, %s1289_s19  ;;  %s1294_s11 = scalar_lea.hbm %s1750_s0, 1024 }
  0x4c   : > { %p1295_p13 = scmp.lt.u32.totalorder %s1579_s15, %s1750_s0  ;;  %p1296_p6 = scmp.lt.u32.totalorder %s1294_s11, %s1289_s19 }
  0x4d   : > { %p1292_p1 = pnand %p1291_p0, %p1290_p12  ;;  %p1298_p3 = scmp.lt.u32.totalorder %s1289_s19, %s1579_s15 }
  0x4e   : > { %p1297_p10 = por %p1296_p6, %p1295_p13 }
  0x4f   : > { %p1293_p2 = pneg %p1292_p1 }
  0x50   : > { %p1299_p7 = por %p1298_p3, %p1297_p10 }
  0x52   : > { %p1300_p9 = pnand %p1299_p7, %p1293_p2 }
  0x54   : > { %1303 = shalt.err (!%p1300_p9)
}
  0x55   : > { %s1304_s10 = scalar_lea.vmem %s1581_s8, 512  ;;  %s1395_s16 = smov [#allocation3]  }
  0x56   : > { %p1305_p12 = scmp.ne.s32.totalorder %s1581_s8, %s1304_s10  ;;  %s1309_s22 = sshll.u32 %s1395_s16, 4  ;;  %s1310_s22 = int_to_ptr.vmem [resolvable:$false] %s1309_s22 }
  0x57   : > { %s1311_s12 = scalar_lea.vmem %s1310_s22, 1024  ;;  %p1312_p4 = scmp.lt.s32.totalorder %s1581_s8, %s1310_s22 }
  0x58   : > { %p1307_p1 = pnand %p1305_p12, %p1291_p0  ;;  %p1313_p13 = scmp.lt.s32.totalorder %s1311_s12, %s1304_s10 }
  0x5a   : > { %p1308_p5 = pneg %p1307_p1  ;;  %p1314_p6 = por %p1313_p13, %p1312_p4 }
  0x5c   : > { %p1315_p10 = pnand %p1314_p6, %p1308_p5 }
  0x5e   : > { %1318 = shalt.err (!%p1315_p10)
}
  0x5f   : > { %1169 = dma.hbm_to_vmem [thread:$0]  (!%p1583_p11), %s1579_s15, 512, %s1581_s8, %s1587_s18, %s1393_s20, %s1393_s20, %s1394_s21  }
  0x60   : > { %257 = sbr.rel (%p1480_p8) target bundleno = 1118 (0x45e), region = 44  ;;  %s1621_s19 = sand.u32 (!%p1480_p8), 1, %s1381_s24  }
  0x61   : > { %s980_s11 = sshll.u32 (!%p1480_p8), %s1621_s19, 5  ;;  %s260_s13 = scalar_lea.sflag (!%p1480_p8), [#allocation4], %s1621_s19 }
  0x62   : > { %s263_s17 = scalar_lea.vmem (!%p1480_p8), [#allocation3], %s980_s11  ;;  %p1767_p4 = scmp.ne.s32.totalorder (!%p1480_p8), %s1760_s28, 0 }
  0x67   : > { %1364 = dma.done.wait (%p1767_p4), %s260_s13, 512  }
  0x68   : > { %1366 = vsyncadd (%p1767_p4), %s260_s13, 4294966784  ;;  %p1768_p5 = scmp.eq.s32.totalorder %s1461_s5, 0 }
  0x6a   : > { %1368 = dma.done.wait (%p1768_p5), [#allocation7], 16384   ;;  %p1769_p8 = pmov %p1768_p5 }
  0x6b   : > { %v1635_v0 = vld [vmem:[%s263_s17] sm:$0xff]  ;;  %v1637_v1 = vld [vmem:[%s263_s17 + $0x8] sm:$0xff]  ;;  %v1639_v2 = vld [vmem:[%s263_s17 + $0x10] sm:$0xff]  ;;  %v1396_v11 = vmov 0.0|0.0   ;;  %vm1397_vm0 = vmmov 0   ;;  %v1398_v12 = vmov 0.0   ;;  %v320_v13 = vlaneseq }
  0x6c   : > { %1370 = vsyncadd (%p1769_p8), [#allocation7], 4294950912  ;;  %v310_v3 = vadd.f32 %v1637_v1, %v1635_v0  ;;  %v304_v4 = vmax.f32 %v1635_v0, %v1637_v1  ;;  %v1645_v5 = vld [vmem:[%s263_s17 + $0x18] sm:$0xff]  ;;  %v348_v8 = vld [vmem:[%s1751_s1] sm:$0xff]  ;;  %1014 = vmatprep.subr.bf16.mxu0 %v1396_v11  ;;  %1006 = vmatprep.mubr.msk.f32.mxu0 %vm1397_vm0, %v1398_v12  ;;  %vm331_vm1 = vcmask 130112   ;;  %vm346_vm2 = vcmask 1040384  }
  0x6d   : > { %v313_v6 = vadd.f32 %v1645_v5, %v1639_v2  ;;  %v307_v7 = vmax.f32 %v1639_v2, %v1645_v5  ;;  %v349_v9 = vld [vmem:[%s1751_s1 + $0x8] sm:$0xff]  ;;  %1009 = vmatprep.subr.mxu1 %v1398_v12  ;;  %1011 = vmatprep.mubr.msk.f32.mxu1 %vm1397_vm0, %v1398_v12  ;;  %v321_v14 = vand.u32 127, %v320_v13  ;;  %v1657_v16 = vshrl.u32 %v320_v13, 7  ;;  %v425_v32 = vld [vmem:[%s1752_s2] sm:$0xf]  ;;  %v562_v37 = vld [vmem:[#allocation6 + $0x18] sm:$0xff] }
  0x6e   : > { %311 = vadd.xlane.f32.xlu0 %v310_v3  ;;  %305 = vmax.xlane.f32.xlu1 %v304_v4  ;;  %v1015_v10 = vpack.c.bf16 %v349_v9, %v348_v8  ;;  %vm350_vm3 = vcmask 130048   ;;  %vm430_vm4 = vcmask 1043456   ;;  %vm426_vm5 = vcmask 31744   ;;  %v560_v36 = vld [vmem:[#allocation6 + $0x8] sm:$0xff]  ;;  %v559_v38 = vld [vmem:[#allocation6] sm:$0xff]  ;;  %v561_v40 = vld [vmem:[#allocation6 + $0x10] sm:$0xff] }
  0x6f   : > { %v326_v15 = vadd.s32 4294967288, %v321_v14  ;;  %v324_v20 = vsub.s32 %v321_v14, %v1657_v16  ;;  %1010 = vmatpush3.msk.msra.mxu1 %vm430_vm4, %v425_v32  ;;  %v1081_v39 = vpack.c.bf16 %v562_v37, %v560_v36  ;;  %v624_v41 = vld [vmem:[#allocation8 + $0x8] sm:$0xff]  ;;  %v626_v42 = vld [vmem:[#allocation8 + $0x18] sm:$0xff]  ;;  %v1083_v43 = vpack.c.bf16 %v561_v40, %v559_v38  ;;  %v623_v45 = vld [vmem:[#allocation8] sm:$0xff]  ;;  %s829_s18 = sld [smem:[#allocation2]]  ;;  %s996_s14 = sshll.u32 %s1461_s5, 9 }
  0x70   : > { %1016 = vmatpush3.bf16.msra.mxu0 %v1015_v10  ;;  %v1017_v44 = vpack.c.bf16 %v626_v42, %v624_v41  ;;  %v625_v46 = vld [vmem:[#allocation8 + $0x10] sm:$0xff]  ;;  %v564_v47 = vld [vmem:[#allocation6 + $0x28] sm:$0xff]  ;;  %v566_v49 = vld [vmem:[#allocation6 + $0x38] sm:$0xff]  ;;  %s299_s10 = scalar_lea.vmem [#allocation9], %s980_s11  ;;  %s1702_s5 = scalar_lea.hbm %s1756_s6, %s996_s14 }
  0x71   : > { %v329_v19 = vsub.s32 %v326_v15, %v1657_v16  ;;  %1082 = vmatprep.subr.bf16.mxu1 %v1081_v39  ;;  %v1019_v48 = vpack.c.bf16 %v625_v46, %v623_v45  ;;  %v563_v50 = vld [vmem:[#allocation6 + $0x20] sm:$0xff]  ;;  %v565_v51 = vld [vmem:[#allocation6 + $0x30] sm:$0xff]  ;;  %v1085_v52 = vpack.c.bf16 %v566_v49, %v564_v47  ;;  %v628_v54 = vld [vmem:[#allocation8 + $0x28] sm:$0xff]  ;;  %s879_s16 = sshll.u32 %s299_s10, 4  ;;  %s866_s11 = scalar_lea.sflag [#allocation5], %s1621_s19  ;;  %s1704_s16 = int_to_ptr.vmem [resolvable:$true] %s879_s16 }
  0x72   : > { %314 = vadd.xlane.f32.xlu0 %v313_v6  ;;  %308 = vmax.xlane.f32.xlu1 %v307_v7  ;;  %v1087_v53 = vpack.c.bf16 %v565_v51, %v563_v50  ;;  %v630_v55 = vld [vmem:[#allocation8 + $0x38] sm:$0xff]  ;;  %v627_v56 = vld [vmem:[#allocation8 + $0x20] sm:$0xff]  ;;  %v629_v58 = vld [vmem:[#allocation8 + $0x30] sm:$0xff]  ;;  %s1319_s13 = scalar_lea.vmem %s1704_s16, 512  ;;  %p1770_p0 = scmp.ne.s32.totalorder %s1765_s27, 0 }
  0x73   : > { %1018 = vmatprep.subr.bf16.mxu0 %v1017_v44  ;;  %v1021_v57 = vpack.c.bf16 %v630_v55, %v628_v54  ;;  %v568_v59 = vld [vmem:[#allocation6 + $0x48] sm:$0xff]  ;;  %v570_v60 = vld [vmem:[#allocation6 + $0x58] sm:$0xff]  ;;  %v1023_v61 = vpack.c.bf16 %v629_v58, %v627_v56  ;;  %v567_v63 = vld [vmem:[#allocation6 + $0x40] sm:$0xff]  ;;  %p1320_p11 = scmp.ne.s32.totalorder %s1704_s16, %s1319_s13  ;;  %s1399_s17 = smov [#allocation9]  }
  0x74   : > { %v1089_v62 = vpack.c.bf16 %v570_v60, %v568_v59  ;;  %v569_v3 = vld [vmem:[#allocation6 + $0x50] sm:$0xff]  ;;  %v632_v4 = vld [vmem:[#allocation8 + $0x48] sm:$0xff]  ;;  %v634_v6 = vld [vmem:[#allocation8 + $0x58] sm:$0xff]  ;;  %s1323_s28 = sshll.u32 %s1399_s17, 4  ;;  %s1324_s28 = int_to_ptr.vmem [resolvable:$false] %s1323_s28 }
  0x75   : > { %v631_v7 = vld [vmem:[#allocation8 + $0x40] sm:$0xff]  ;;  %v633_v8 = vld [vmem:[#allocation8 + $0x50] sm:$0xff]  ;;  %v1091_v9 = vpack.c.bf16 %v569_v3, %v567_v63  ;;  %v1025_v10 = vpack.c.bf16 %v634_v6, %v632_v4  ;;  %v572_v11 = vld [vmem:[#allocation6 + $0x68] sm:$0xff]  ;;  %p1321_p2 = pnand %p1320_p11, %p1770_p0  ;;  %s1325_s30 = scalar_lea.vmem %s1324_s28, 1024 }
  0x76   : > { %v574_v12 = vld [vmem:[#allocation6 + $0x78] sm:$0xff]  ;;  %v571_v13 = vld [vmem:[#allocation6 + $0x60] sm:$0xff]  ;;  %v1027_v14 = vpack.c.bf16 %v633_v8, %v631_v7  ;;  %v644_v37 = vld [vmem:[#allocation8 + $0xa8] sm:$0xff]  ;;  %p1326_p7 = scmp.lt.s32.totalorder %s1704_s16, %s1324_s28  ;;  %p1327_p9 = scmp.lt.s32.totalorder %s1325_s30, %s1319_s13 }
  0x77   : > { %v1093_v15 = vpack.c.bf16 %v574_v12, %v572_v11  ;;  %v639_v32 = vld [vmem:[#allocation8 + $0x80] sm:$0xff]  ;;  %v582_v36 = vld [vmem:[#allocation6 + $0xb8] sm:$0xff]  ;;  %v645_v46 = vld [vmem:[#allocation8 + $0xb0] sm:$0xff]  ;;  %p1322_p3 = pneg %p1321_p2 }
  0x78   : > { %v646_v38 = vld [vmem:[#allocation8 + $0xb8] sm:$0xff]  ;;  %v579_v42 = vld [vmem:[#allocation6 + $0xa0] sm:$0xff]  ;;  %v584_v47 = vld [vmem:[#allocation6 + $0xc8] sm:$0xff]  ;;  %p1328_p12 = por %p1327_p9, %p1326_p7 }
  0x79   : > { %v643_v44 = vld [vmem:[#allocation8 + $0xa0] sm:$0xff]  ;;  %v1037_v45 = vpack.c.bf16 %v646_v38, %v644_v37  ;;  %v648_v49 = vld [vmem:[#allocation8 + $0xc8] sm:$0xff]  ;;  %v650_v50 = vld [vmem:[#allocation8 + $0xd8] sm:$0xff] }
  0x7a   : > { %v583_v54 = vld [vmem:[#allocation6 + $0xc0] sm:$0xff]  ;;  %v585_v55 = vld [vmem:[#allocation6 + $0xd0] sm:$0xff]  ;;  %v588_v59 = vld [vmem:[#allocation6 + $0xe8] sm:$0xff]  ;;  %p1329_p1 = pnand %p1328_p12, %p1322_p3 }
  0x7b   : > { %v647_v56 = vld [vmem:[#allocation8 + $0xc0] sm:$0xff]  ;;  %v649_v58 = vld [vmem:[#allocation8 + $0xd0] sm:$0xff]  ;;  %v590_v60 = vld [vmem:[#allocation6 + $0xf8] sm:$0xff]  ;;  %v1107_v63 = vpack.c.bf16 %v585_v55, %v583_v54 }
  0x7c   : > { %v1043_v3 = vpack.c.bf16 %v649_v58, %v647_v56  ;;  %v1109_v4 = vpack.c.bf16 %v590_v60, %v588_v59  ;;  %v587_v6 = vld [vmem:[#allocation6 + $0xe0] sm:$0xff]  ;;  %v589_v7 = vld [vmem:[#allocation6 + $0xf0] sm:$0xff]  ;;  %v592_v11 = vld [vmem:[#allocation6 + $0x108] sm:$0xff] }
  0x7d   : > { %v651_v8 = vld [vmem:[#allocation8 + $0xe0] sm:$0xff]  ;;  %v594_v12 = vld [vmem:[#allocation6 + $0x118] sm:$0xff]  ;;  %v664_v38 = vld [vmem:[#allocation8 + $0x148] sm:$0xff] }
  0x7e   : > { %v602_v37 = vld [vmem:[#allocation6 + $0x158] sm:$0xff]  ;;  %v603_v55 = vld [vmem:[#allocation6 + $0x160] sm:$0xff]  ;;  %v605_v56 = vld [vmem:[#allocation6 + $0x170] sm:$0xff] }
  0x7f   : > { %v1127_v58 = vpack.c.bf16 %v605_v56, %v603_v55 }
  0xfb   : > { %v312_v17 = vpop.xlane.xlu0 %311  ;;  %v306_v18 = vpop.xlane.xlu1 %305 }
  0xfc   : > { %v316_v21 = vmul.f32 0.00390625, %v312_v17  ;;  %v325_v27 = vrot.slane %v306_v18, %v324_v20  ;;  %v573_v17 = vld [vmem:[#allocation6 + $0x70] sm:$0xff]  ;;  %v636_v18 = vld [vmem:[#allocation8 + $0x68] sm:$0xff] }
  0xfe   : > { %v339_v26 = vrot.slane %v316_v21, %v324_v20  ;;  %v635_v21 = vld [vmem:[#allocation8 + $0x60] sm:$0xff] }
  0xff   : > { %v315_v22 = vpop.xlane.xlu0 %314  ;;  %v309_v23 = vpop.xlane.xlu1 %308 }
 0x100   : > { %v317_v24 = vmul.f32 0.00390625, %v315_v22  ;;  %v330_v25 = vrot.slane %v309_v23, %v329_v19  ;;  %v637_v22 = vld [vmem:[#allocation8 + $0x70] sm:$0xff]  ;;  %v576_v23 = vld [vmem:[#allocation6 + $0x88] sm:$0xff] }
 0x102   : > { %v343_v28 = vrot.slane %v317_v24, %v329_v19  ;;  %v332_v29 = vsel %vm331_vm1, %v330_v25, %v325_v27  ;;  %v638_v19 = vld [vmem:[#allocation8 + $0x78] sm:$0xff]  ;;  %v1095_v25 = vpack.c.bf16 %v573_v17, %v571_v13  ;;  %v656_v13 = vld [vmem:[#allocation8 + $0x108] sm:$0xff] }
 0x103   : > { %v1029_v20 = vpack.c.bf16 %v638_v19, %v636_v18  ;;  %v578_v24 = vld [vmem:[#allocation6 + $0x98] sm:$0xff]  ;;  %v1113_v18 = vpack.c.bf16 %v594_v12, %v592_v11  ;;  %v591_v19 = vld [vmem:[#allocation6 + $0x100] sm:$0xff] }
 0x104   : > { %v344_v30 = vsel %vm331_vm1, %v343_v28, %v339_v26  ;;  %v640_v26 = vld [vmem:[#allocation8 + $0x88] sm:$0xff]  ;;  %v642_v27 = vld [vmem:[#allocation8 + $0x98] sm:$0xff]  ;;  %v1031_v28 = vpack.c.bf16 %v637_v22, %v635_v21  ;;  %v655_v21 = vld [vmem:[#allocation8 + $0x100] sm:$0xff] }
 0x105   : > { %v347_v31 = vsel %vm346_vm2, %v332_v29, %v344_v30  ;;  %v1097_v29 = vpack.c.bf16 %v578_v24, %v576_v23  ;;  %v575_v30 = vld [vmem:[#allocation6 + $0x80] sm:$0xff]  ;;  %v657_v23 = vld [vmem:[#allocation8 + $0x110] sm:$0xff]  ;;  %v596_v24 = vld [vmem:[#allocation6 + $0x128] sm:$0xff] }
 0x106   : > { %1007 = vmatmul.mubr.msk.f32.vlgmr.msra.gmra.mrb[0].mxu0 %vm350_vm3, %v347_v31  ;;  %v577_v31 = vld [vmem:[#allocation6 + $0x90] sm:$0xff]  ;;  %v607_v12 = vld [vmem:[#allocation6 + $0x180] sm:$0xff] }
 0x107   : > { %1020 = vmatpush1.bf16.msra.mxu0 %v1019_v48  ;;  %v1099_v39 = vpack.c.bf16 %v577_v31, %v575_v30  ;;  %v586_v48 = vld [vmem:[#allocation6 + $0xd8] sm:$0xff]  ;;  %v595_v31 = vld [vmem:[#allocation6 + $0x120] sm:$0xff] }
 0x108   : > { %1022 = vmatprep.subr.bf16.mxu0 %v1021_v57  ;;  %v1041_v57 = vpack.c.bf16 %v650_v50, %v648_v49  ;;  %v606_v49 = vld [vmem:[#allocation6 + $0x178] sm:$0xff]  ;;  %v668_v50 = vld [vmem:[#allocation8 + $0x168] sm:$0xff] }
 0x10b   : > { %1024 = vmatpush1.bf16.msra.mxu0 %v1023_v61  ;;  %v652_v61 = vld [vmem:[#allocation8 + $0xe8] sm:$0xff] }
 0x10c   : > { %1026 = vmatprep.subr.bf16.mxu0 %v1025_v10  ;;  %v653_v10 = vld [vmem:[#allocation8 + $0xf0] sm:$0xff] }
 0x10d   : > { %v1047_v17 = vpack.c.bf16 %v653_v10, %v651_v8  ;;  %v610_v10 = vld [vmem:[#allocation6 + $0x198] sm:$0xff] }
 0x10f   : > { %1028 = vmatpush1.bf16.msra.mxu0 %v1027_v14  ;;  %v658_v14 = vld [vmem:[#allocation8 + $0x118] sm:$0xff] }
 0x110   : > { %1030 = vmatprep.subr.bf16.mxu0 %v1029_v20  ;;  %v593_v20 = vld [vmem:[#allocation6 + $0x110] sm:$0xff]  ;;  %v1049_v22 = vpack.c.bf16 %v658_v14, %v656_v13 }
 0x111   : > { %v609_v13 = vld [vmem:[#allocation6 + $0x190] sm:$0xff] }
 0x112   : > { %v1131_v14 = vpack.c.bf16 %v609_v13, %v607_v12 }
 0x113   : > { %1032 = vmatpush1.bf16.msra.mxu0 %v1031_v28  ;;  %v1115_v28 = vpack.c.bf16 %v593_v20, %v591_v19  ;;  %v671_v19 = vld [vmem:[#allocation8 + $0x180] sm:$0xff]  ;;  %v673_v20 = vld [vmem:[#allocation8 + $0x190] sm:$0xff] }
 0x1d9   : > { %v420_v33 = vpop.f32.mrb[0].mxu0 }
 0x1da   : > { %v424_v34 = vmax.f32 %v420_v33, 0.0  ;;  %v1008_v35 = vpop.f32.mrb[1].mxu0  ;;  %v1033_v33 = vpack.c.bf16 %v642_v27, %v640_v26  ;;  %v660_v26 = vld [vmem:[#allocation8 + $0x128] sm:$0xff]  ;;  %v662_v27 = vld [vmem:[#allocation8 + $0x138] sm:$0xff] }
 0x1db   : > { %v580_v35 = vld [vmem:[#allocation6 + $0xa8] sm:$0xff] }
 0x1dc   : > { %1012 = vmatmul.mubr.msk.f32.vlgmr.msra.gmra.mrb[0].mxu1 %vm426_vm5, %v424_v34  ;;  %v641_v34 = vld [vmem:[#allocation8 + $0x90] sm:$0xff]  ;;  %v1101_v41 = vpack.c.bf16 %v582_v36, %v580_v35  ;;  %1034 = vmatprep.subr.bf16.mxu0 %v1033_v33  ;;  %v659_v33 = vld [vmem:[#allocation8 + $0x120] sm:$0xff]  ;;  %v600_v36 = vld [vmem:[#allocation6 + $0x148] sm:$0xff] }
 0x1dd   : > { %1084 = vmatpush1.bf16.msra.mxu1 %v1083_v43  ;;  %v1035_v40 = vpack.c.bf16 %v641_v34, %v639_v32  ;;  %v581_v43 = vld [vmem:[#allocation6 + $0xb0] sm:$0xff]  ;;  %v1053_v34 = vpack.c.bf16 %v662_v27, %v660_v26 }
 0x1de   : > { %1086 = vmatprep.subr.bf16.mxu1 %v1085_v52  ;;  %v1103_v51 = vpack.c.bf16 %v581_v43, %v579_v42  ;;  %v1039_v52 = vpack.c.bf16 %v645_v46, %v643_v44  ;;  %v597_v32 = vld [vmem:[#allocation6 + $0x130] sm:$0xff]  ;;  %v1121_v42 = vpack.c.bf16 %v602_v37, %v600_v36  ;;  %v599_v43 = vld [vmem:[#allocation6 + $0x140] sm:$0xff]  ;;  %v1665_v36 = vsub.s32 0, %v1657_v16 }
 0x1df   : > { %1036 = vmatpush1.bf16.msra.mxu0 %v1035_v40  ;;  %v661_v35 = vld [vmem:[#allocation8 + $0x130] sm:$0xff]  ;;  %v1119_v40 = vpack.c.bf16 %v597_v32, %v595_v31  ;;  %v675_v31 = vld [vmem:[#allocation8 + $0x1a0] sm:$0xff] }
 0x1e0   : > { %1038 = vmatprep.subr.bf16.mxu0 %v1037_v45  ;;  %v601_v44 = vld [vmem:[#allocation6 + $0x150] sm:$0xff]  ;;  %v663_v45 = vld [vmem:[#allocation8 + $0x140] sm:$0xff] }
 0x1e1   : > { %1088 = vmatpush1.bf16.msra.mxu1 %v1087_v53  ;;  %v1105_v53 = vpack.c.bf16 %v586_v48, %v584_v47  ;;  %v665_v47 = vld [vmem:[#allocation8 + $0x150] sm:$0xff]  ;;  %v604_v48 = vld [vmem:[#allocation6 + $0x168] sm:$0xff] }
 0x1e2   : > { %1090 = vmatprep.subr.bf16.mxu1 %v1089_v62  ;;  %v654_v62 = vld [vmem:[#allocation8 + $0xf8] sm:$0xff]  ;;  %v1125_v54 = vpack.c.bf16 %v606_v49, %v604_v48  ;;  %v613_v26 = vld [vmem:[#allocation6 + $0x1b0] sm:$0xff]  ;;  %v620_v48 = vld [vmem:[#allocation6 + $0x1e8] sm:$0xff] }
 0x1e3   : > { %1040 = vmatpush1.bf16.msra.mxu0 %v1039_v52  ;;  %v1123_v52 = vpack.c.bf16 %v601_v44, %v599_v43  ;;  %v677_v32 = vld [vmem:[#allocation8 + $0x1b0] sm:$0xff]  ;;  %v679_v44 = vld [vmem:[#allocation8 + $0x1c0] sm:$0xff]  ;;  %v622_v49 = vld [vmem:[#allocation6 + $0x1f8] sm:$0xff] }
 0x1e4   : > { %1042 = vmatprep.subr.bf16.mxu0 %v1041_v57 }
 0x1e5   : > { %1092 = vmatpush1.bf16.msra.mxu1 %v1091_v9  ;;  %v1045_v9 = vpack.c.bf16 %v654_v62, %v652_v61 }
 0x1e6   : > { %1094 = vmatprep.subr.bf16.mxu1 %v1093_v15  ;;  %v1111_v15 = vpack.c.bf16 %v589_v7, %v587_v6  ;;  %v669_v6 = vld [vmem:[#allocation8 + $0x170] sm:$0xff] }
 0x1e7   : > { %1044 = vmatpush1.bf16.msra.mxu0 %v1043_v3 }
 0x1e8   : > { %1046 = vmatprep.subr.bf16.mxu0 %v1045_v9  ;;  %v608_v9 = vld [vmem:[#allocation6 + $0x188] sm:$0xff] }
 0x1e9   : > { %1096 = vmatpush1.bf16.msra.mxu1 %v1095_v25  ;;  %v598_v25 = vld [vmem:[#allocation6 + $0x138] sm:$0xff]  ;;  %v1129_v11 = vpack.c.bf16 %v610_v10, %v608_v9 }
 0x1ea   : > { %1098 = vmatprep.subr.bf16.mxu1 %v1097_v29  ;;  %v1051_v29 = vpack.c.bf16 %v657_v23, %v655_v21  ;;  %v1117_v30 = vpack.c.bf16 %v598_v25, %v596_v24  ;;  %v1067_v21 = vpack.c.bf16 %v673_v20, %v671_v19  ;;  %v614_v23 = vld [vmem:[#allocation6 + $0x1b8] sm:$0xff]  ;;  %v611_v25 = vld [vmem:[#allocation6 + $0x1a0] sm:$0xff] }
 0x1eb   : > { %1048 = vmatpush1.bf16.msra.mxu0 %v1047_v17  ;;  %v674_v17 = vld [vmem:[#allocation8 + $0x198] sm:$0xff]  ;;  %v1135_v27 = vpack.c.bf16 %v613_v26, %v611_v25 }
 0x1ec   : > { %1050 = vmatprep.subr.bf16.mxu0 %v1049_v22  ;;  %v612_v22 = vld [vmem:[#allocation6 + $0x1a8] sm:$0xff] }
 0x1ed   : > { %1100 = vmatpush1.bf16.msra.mxu1 %v1099_v39  ;;  %v666_v39 = vld [vmem:[#allocation8 + $0x158] sm:$0xff]  ;;  %v1133_v24 = vpack.c.bf16 %v614_v23, %v612_v22 }
 0x1ee   : > { %1102 = vmatprep.subr.bf16.mxu1 %v1101_v41  ;;  %v1055_v41 = vpack.c.bf16 %v661_v35, %v659_v33  ;;  %v1057_v46 = vpack.c.bf16 %v666_v39, %v664_v38  ;;  %v1071_v33 = vpack.c.bf16 %v677_v32, %v675_v31  ;;  %v618_v35 = vld [vmem:[#allocation6 + $0x1d8] sm:$0xff]  ;;  %v615_v38 = vld [vmem:[#allocation6 + $0x1c0] sm:$0xff]  ;;  %v617_v39 = vld [vmem:[#allocation6 + $0x1d0] sm:$0xff] }
 0x1ef   : > { %1052 = vmatpush1.bf16.msra.mxu0 %v1051_v29  ;;  %v678_v29 = vld [vmem:[#allocation8 + $0x1b8] sm:$0xff] }
 0x1f0   : > { %1054 = vmatprep.subr.bf16.mxu0 %v1053_v34  ;;  %v616_v34 = vld [vmem:[#allocation6 + $0x1c8] sm:$0xff] }
 0x1f1   : > { %1104 = vmatpush1.bf16.msra.mxu1 %v1103_v51  ;;  %v670_v51 = vld [vmem:[#allocation8 + $0x178] sm:$0xff]  ;;  %v1137_v37 = vpack.c.bf16 %v618_v35, %v616_v34 }
 0x1f2   : > { %1106 = vmatprep.subr.bf16.mxu1 %v1105_v53  ;;  %v1059_v53 = vpack.c.bf16 %v665_v47, %v663_v45  ;;  %v1061_v57 = vpack.c.bf16 %v670_v51, %v668_v50  ;;  %v681_v45 = vld [vmem:[#allocation8 + $0x1d0] sm:$0xff]  ;;  %v619_v50 = vld [vmem:[#allocation6 + $0x1e0] sm:$0xff]  ;;  %v1141_v51 = vpack.c.bf16 %v622_v49, %v620_v48 }
 0x1f3   : > { %1056 = vmatpush1.bf16.msra.mxu0 %v1055_v41  ;;  %v680_v41 = vld [vmem:[#allocation8 + $0x1c8] sm:$0xff]  ;;  %v1075_v47 = vpack.c.bf16 %v681_v45, %v679_v44 }
 0x1f4   : > { %1058 = vmatprep.subr.bf16.mxu0 %v1057_v46 }
 0x1f5   : > { %1108 = vmatpush1.bf16.msra.mxu1 %v1107_v63 }
 0x1f6   : > { %1110 = vmatprep.subr.bf16.mxu1 %v1109_v4  ;;  %v667_v4 = vld [vmem:[#allocation8 + $0x160] sm:$0xff] }
 0x1f7   : > { %1060 = vmatpush1.bf16.msra.mxu0 %v1059_v53  ;;  %v1063_v8 = vpack.c.bf16 %v669_v6, %v667_v4  ;;  %v684_v53 = vld [vmem:[#allocation8 + $0x1e8] sm:$0xff] }
 0x1f8   : > { %1062 = vmatprep.subr.bf16.mxu0 %v1061_v57  ;;  %v683_v57 = vld [vmem:[#allocation8 + $0x1e0] sm:$0xff] }
 0x1f9   : > { %1112 = vmatpush1.bf16.msra.mxu1 %v1111_v15  ;;  %v672_v15 = vld [vmem:[#allocation8 + $0x188] sm:$0xff] }
 0x1fa   : > { %1114 = vmatprep.subr.bf16.mxu1 %v1113_v18  ;;  %v1065_v18 = vpack.c.bf16 %v674_v17, %v672_v15 }
 0x1fb   : > { %1064 = vmatpush1.bf16.msra.mxu0 %v1063_v8 }
 0x1fc   : > { %1066 = vmatprep.subr.bf16.mxu0 %v1065_v18 }
 0x1fd   : > { %1116 = vmatpush1.bf16.msra.mxu1 %v1115_v28  ;;  %v676_v28 = vld [vmem:[#allocation8 + $0x1a8] sm:$0xff] }
 0x1fe   : > { %1118 = vmatprep.subr.bf16.mxu1 %v1117_v30  ;;  %v1069_v30 = vpack.c.bf16 %v678_v29, %v676_v28 }
 0x1ff   : > { %1068 = vmatpush1.bf16.msra.mxu0 %v1067_v21 }
 0x200   : > { %1070 = vmatprep.subr.bf16.mxu0 %v1069_v30 }
 0x201   : > { %1120 = vmatpush1.bf16.msra.mxu1 %v1119_v40  ;;  %v1139_v40 = vpack.c.bf16 %v617_v39, %v615_v38 }
 0x202   : > { %1122 = vmatprep.subr.bf16.mxu1 %v1121_v42  ;;  %v682_v42 = vld [vmem:[#allocation8 + $0x1d8] sm:$0xff] }
 0x203   : > { %1072 = vmatpush1.bf16.msra.mxu0 %v1071_v33  ;;  %v1073_v43 = vpack.c.bf16 %v682_v42, %v680_v41  ;;  %v830_v41 = vstv %s829_s18 }
 0x205   : > { %1124 = vmatpush1.bf16.msra.mxu1 %v1123_v52  ;;  %1074 = vmatprep.subr.bf16.mxu0 %v1073_v43  ;;  %v621_v52 = vld [vmem:[#allocation6 + $0x1f0] sm:$0xff] }
 0x206   : > { %1126 = vmatprep.subr.bf16.mxu1 %v1125_v54  ;;  %v686_v54 = vld [vmem:[#allocation8 + $0x1f8] sm:$0xff]  ;;  %v1143_v55 = vpack.c.bf16 %v621_v52, %v619_v50 }
 0x207   : > { %1076 = vmatpush1.bf16.msra.mxu0 %v1075_v47  ;;  %v1077_v56 = vpack.c.bf16 %v686_v54, %v684_v53 }
 0x209   : > { %1128 = vmatpush1.bf16.msra.mxu1 %v1127_v58  ;;  %v685_v58 = vld [vmem:[#allocation8 + $0x1f0] sm:$0xff]  ;;  %1078 = vmatprep.subr.bf16.mxu0 %v1077_v56 }
 0x20a   : > { %1130 = vmatprep.subr.bf16.mxu1 %v1129_v11 }
 0x20d   : > { %1132 = vmatpush1.bf16.msra.mxu1 %v1131_v14 }
 0x20e   : > { %1134 = vmatprep.subr.bf16.mxu1 %v1133_v24 }
 0x211   : > { %1136 = vmatpush1.bf16.msra.mxu1 %v1135_v27 }
 0x212   : > { %1138 = vmatprep.subr.bf16.mxu1 %v1137_v37 }
 0x215   : > { %1140 = vmatpush1.bf16.msra.mxu1 %v1139_v40 }
 0x216   : > { %1142 = vmatprep.subr.bf16.mxu1 %v1141_v51 }
 0x219   : > { %1144 = vmatpush1.bf16.msra.mxu1 %v1143_v55 }
 0x2af   : > { %v500_v59 = vpop.f32.mrb[0].mxu1 }
 0x2b0   : > { %v505_v60 = vrot.slane %v500_v59, 1  ;;  %v1013_v61 = vpop.f32.mrb[1].mxu1 }
 0x2b2   : > { %v507_v62 = vadd.f32 %v505_v60, %v500_v59  ;;  %v1079_v59 = vpack.c.bf16 %v685_v58, %v683_v57 }
 0x2b4   : > { %v987_v63 = vmul.f32 -1.442695, %v507_v62  ;;  %1080 = vmatpush1.bf16.msra.mxu0 %v1079_v59 }
 0x2b6   : > { %1221 = vpow2.f32 %v987_v63 }
 0x2c0   : > { %v1222_v3 = vpop.eup %1221 }
 0x2c1   : > { %v511_v7 = vadd.f32 1.0, %v1222_v3 }
 0x2c3   : > { %1223 = vrcp.f32 %v511_v7 }
 0x2cd   : > { %v1224_v46 = vpop.eup %1223 }
 0x2ce   : > { %v517_v16 = vrot.slane %v1224_v46, %v1665_v36 }
 0x2d0   : > { %523 = vbcast.lane.b32.xlu1 %v517_v16, 264  ;;  %519 = vbcast.lane.b32.xlu0 %v517_v16, 256 }
 0x342   : > { %v524_v60 = vpop.permute.xlu1 %523  ;;  %v520_v61 = vpop.permute.xlu0 %519 }
 0x343   : > { %v1669_v62 = vmul.f32 %v524_v60, %v1639_v2  ;;  %v1672_v63 = vmul.f32 %v524_v60, %v1645_v5  ;;  %v1675_v3 = vmul.f32 %v520_v61, %v1635_v0  ;;  %v1678_v4 = vmul.f32 %v520_v61, %v1637_v1 }
 0x345   : > { %v529_v6 = vmax.f32 %v1675_v3, %v1669_v62  ;;  %v536_v7 = vmax.f32 %v1678_v4, %v1672_v63  ;;  %v543_v8 = vadd.f32 %v1669_v62, %v1675_v3  ;;  %v550_v9 = vadd.f32 %v1672_v63, %v1678_v4 }
 0x347   : > { %v530_v10 = vrot.slane %v529_v6, 4  ;;  %v537_v11 = vrot.slane %v536_v7, 4  ;;  %v544_v12 = vrot.slane %v543_v8, 4  ;;  %v551_v13 = vrot.slane %v550_v9, 4 }
 0x349   : > { %v531_v14 = vmax.f32 %v529_v6, %v530_v10  ;;  %v538_v15 = vmax.f32 %v536_v7, %v537_v11  ;;  %v545_v17 = vadd.f32 %v544_v12, %v543_v8  ;;  %v552_v18 = vadd.f32 %v551_v13, %v550_v9 }
 0x34b   : > { %v532_v19 = vrot.slane %v531_v14, 2  ;;  %v546_v20 = vrot.slane %v545_v17, 2  ;;  %v539_v21 = vrot.slane %v538_v15, 2  ;;  %v553_v22 = vrot.slane %v552_v18, 2 }
 0x34d   : > { %v533_v23 = vmax.f32 %v531_v14, %v532_v19  ;;  %v547_v24 = vadd.f32 %v546_v20, %v545_v17  ;;  %v540_v25 = vmax.f32 %v538_v15, %v539_v21  ;;  %v554_v26 = vadd.f32 %v553_v22, %v552_v18 }
 0x34f   : > { %v541_v27 = vrot.slane %v540_v25, 1  ;;  %v534_v28 = vrot.slane %v533_v23, 1  ;;  %v555_v29 = vrot.slane %v554_v26, 1  ;;  %v548_v30 = vrot.slane %v547_v24, 1 }
 0x351   : > { %v542_v31 = vmax.f32 %v540_v25, %v541_v27  ;;  %v535_v32 = vmax.f32 %v533_v23, %v534_v28  ;;  %v556_v33 = vadd.f32 %v555_v29, %v554_v26  ;;  %v549_v34 = vadd.f32 %v548_v30, %v547_v24 }
 0x353   : > { %822 = vmatprep.mubr.f32.mxu1 %v542_v31  ;;  %v558_v35 = vmul.f32 0.0625, %v556_v33  ;;  %v557_v37 = vmul.f32 0.0625, %v549_v34 }
 0x354   : > { %823 = vmatmul.mubr.f32.vlgmr.msra.gmra.mrb[2].mxu1 %v535_v32 }
 0x355   : > { %751 = vmatprep.mubr.f32.mxu0 %v558_v35 }
 0x356   : > { %752 = vmatmul.mubr.f32.vlgmr.msra.gmra.mrb[2].mxu0 %v557_v37 }
 0x427   : > { %v824_v38 = vpop.f32.mrb[2].mxu1 }
 0x428   : > { %v826_v39 = vpop.f32.mrb[3].mxu1 }
 0x429   : > { %v753_v40 = vpop.f32.mrb[2].mxu0 }
 0x42a   : > { %v825_v42 = vadd.f32 %v824_v38, %v753_v40  ;;  %v755_v43 = vpop.f32.mrb[3].mxu0 }
 0x42b   : > { %v827_v44 = vadd.f32 %v826_v39, %v755_v43 }
 0x42c   : > { %v831_v45 = vadd.f32 %v830_v41, %v825_v42 }
 0x42d   : > { %v832_v46 = vadd.f32 %v830_v41, %v827_v44 }
 0x42e   : > { %v988_v47 = vmul.f32 -1.442695, %v831_v45 }
 0x42f   : > { %v989_v48 = vmul.f32 -1.442695, %v832_v46 }
 0x430   : > { %1225 = vpow2.f32 %v988_v47 }
 0x431   : > { %1227 = vpow2.f32 %v989_v48 }
 0x43a   : > { %v1226_v49 = vpop.eup %1225 }
 0x43b   : > { %v1228_v50 = vpop.eup %1227  ;;  %v839_v16 = vadd.f32 1.0, %v1226_v49 }
 0x43c   : > { %v840_v51 = vadd.f32 1.0, %v1228_v50 }
 0x43d   : > { %1229 = vrcp.f32 %v839_v16 }
 0x43e   : > { %1231 = vrcp.f32 %v840_v51 }
 0x447   : > { %v1230_v52 = vpop.eup %1229 }
 0x448   : > { %v1232_v53 = vpop.eup %1231  ;;  %v848_v54 = vrot.slane %v1230_v52, %v1665_v36 }
 0x449   : > { %v852_v55 = vrot.slane %v1232_v53, %v1665_v36 }
 0x44a   : > { %v853_v56 = vmul.f32 %v848_v54, %v1675_v3  ;;  %v855_v57 = vmul.f32 %v848_v54, %v1669_v62 }
 0x44b   : > { %v854_v58 = vmul.f32 %v852_v55, %v1678_v4  ;;  %v856_v59 = vmul.f32 %v852_v55, %v1672_v63 }
 0x44c   : > { %v857_v60 = vadd.f32 %v853_v56, %v1635_v0  ;;  %v859_v61 = vadd.f32 %v855_v57, %v1639_v2 }
 0x44d   : > { %v858_v36 = vadd.f32 %v854_v58, %v1637_v1  ;;  %v860_v62 = vadd.f32 %v856_v59, %v1645_v5 }
 0x44e   : > { %861 = vst [vmem:[%s299_s10] sm:$0xff] %v857_v60  ;;  %863 = vst [vmem:[%s299_s10 + $0x10] sm:$0xff] %v859_v61 }
 0x44f   : > { %862 = vst [vmem:[%s299_s10 + $0x8] sm:$0xff] %v858_v36  ;;  %864 = vst [vmem:[%s299_s10 + $0x18] sm:$0xff] %v860_v62 }
 0x450   : > { %1332 = shalt.err (!%p1329_p1)
}
 0x451   : > { %s1333_s20 = scalar_lea.hbm %s1702_s5, 512  ;;  %s1337_s8 = scalar_lea.hbm %s1756_s6, 1024 }
 0x452   : > { %p1334_p13 = scmp.ne.s32.totalorder %s1702_s5, %s1333_s20  ;;  %p1338_p4 = scmp.lt.u32.totalorder %s1702_s5, %s1756_s6 }
 0x453   : > { %p1339_p5 = scmp.lt.u32.totalorder %s1337_s8, %s1333_s20  ;;  %p1341_p11 = scmp.lt.u32.totalorder %s1333_s20, %s1702_s5 }
 0x454   : > { %p1335_p6 = pnand %p1334_p13, %p1770_p0 }
 0x455   : > { %p1340_p8 = por %p1339_p5, %p1338_p4 }
 0x456   : > { %p1336_p10 = pneg %p1335_p6 }
 0x457   : > { %p1342_p2 = por %p1341_p11, %p1340_p8 }
 0x459   : > { %p1343_p3 = pnand %p1342_p2, %p1336_p10 }
 0x45b   : > { %1346 = shalt.err (!%p1343_p3)
}
 0x45c   : > { %s1400_s10 = smov 256   ;;  %s1401_s22 = smov 16  }
 0x45d   : > { %1157 = dma.vmem_to_hbm [thread:$0]  (%p1770_p0), %s1704_s16, 512, %s1702_s5, %s866_s11, %s1400_s10, %s1400_s10, %s1401_s22  }
 0x45e PF: > { %s894_s12 = sand.u32 1, %s1377_s23   ;;  %p1771_p7 = scmp.ne.s32.totalorder %s1761_s29, 0 }
 0x45f   : > { %p1772_p9 = scmp.ge.s32.totalorder %s1389_s26, 2  ;;  %s895_s13 = scalar_lea.sflag [#allocation5], %s894_s12 }
 0x461   : > { %p1171_p12 = pnand %p1772_p9, %p1771_p7 }
 0x463   : > { %1372 = dma.done.wait (!%p1171_p12), %s895_s13, 512  }
 0x464   : > { %1374 = vsyncadd (!%p1171_p12), %s895_s13, 4294966784  ;;  %p21_p1 = scmp.ge.s32.totalorder %s1556_s9, 4   ;;  %s1773_s23 = smov %s1381_s24 }
 0x465   : > { %s1774_s24 = smov %s1385_s25  ;;  %s1775_s25 = smov %s1572_s7 }
 0x466   : > { %s1776_s26 = smov %s1556_s9  ;;  %23 = sbr.rel (!%p21_p1) target bundleno = 8 (0x8), region = 97 }
 0x46d   :  { %900 = vsyncpa [#allocation4], 1 }
 0x46e   :  { %902 = vsyncpa [#allocation4 + $0x1], 1 }
 0x46f   :  { %903 = vsyncpa [#allocation7], 1 }
 0x470   :  { %904 = vsyncpa [#allocation5], 1 }
 0x471   :  { %906 = vsyncpa [#allocation5 + $0x1], 1 }

</bundles_post_ra>
